<compile_context>
chip_gen: v7x
topology: tpu7x:2x2x1
jax: 0.10.0
libtpu: 0.0.40
codegen_flags: <defaults>
</compile_context>

<pallas_src>
import functools

import jax
import jax.numpy as jnp
from jax.experimental import pallas as pl
from jax.experimental.pallas import tpu as pltpu


# ----------------------------- helpers ---------------------------------------

def _vmem_limit_bytes():
    """Per-generation scoped-VMEM budget (~3/4 of physical VMEM).
    v5e/v6e: 128 MiB physical (16/32 MiB default scoped), v7x: 64 MiB."""
    try:
        cap = int(pltpu.get_tpu_info().vmem_capacity_bytes)
    except Exception:
        cap = 64 * 1024 * 1024          # conservative fallback: v7x physical
    return (cap * 3) // 4


_VMEM_LIMIT = _vmem_limit_bytes()


def _fit(dim, target, align, pref=256):
    """Largest tile <= target that divides `dim`, preferring multiples of
    `pref` (v7x MXU is 2x256x256), then multiples of `align`.  Falls back to
    the full dim (always BlockSpec-legal; note this can create one large block
    for awkward, non-divisible dims)."""
    if dim <= target:
        return dim
    if pref:
        t = (target // pref) * pref
        while t >= pref:
            if dim % t == 0:
                return t
            t -= pref
    t = (target // align) * align
    while t >= align:
        if dim % t == 0:
            return t
        t -= align
    return dim


# ----------------------------- matmul kernels --------------------------------

def _make_matmul_kernel(has_bias, has_res):
    def kernel(x_ref, w_ref, *rest):
        idx = 0
        b_ref = rest[idx] if has_bias else None
        idx += 1 if has_bias else 0
        r_ref = rest[idx] if has_res else None
        idx += 1 if has_res else 0
        o_ref, acc_ref = rest[idx], rest[idx + 1]

        k = pl.program_id(2)

        @pl.when(k == 0)
        def _():
            acc_ref[...] = jnp.zeros_like(acc_ref)

        acc_ref[...] += jnp.dot(x_ref[...], w_ref[...],
                                preferred_element_type=jnp.float32)

        @pl.when(k == pl.num_programs(2) - 1)
        def _():
            out = acc_ref[...]
            if has_bias:
                out = out + b_ref[...]
            if has_res:                      # fused residual add (x + proj(..))
                out = out + r_ref[...].astype(jnp.float32)
            o_ref[...] = out.astype(o_ref.dtype)

    return kernel


def matmul(x, w, b=None, residual=None, *, out_dtype=jnp.float32,
           tm=256, tn=512, tk=512):
    """Tiled, pipelined matmul.  x: [M, K] bf16, w: [K, N] bf16, b: [N] f32,
    residual: [M, N] bf16 (added in the finalize)."""
    M, K = x.shape
    _, N = w.shape
    tm = _fit(M, tm, 16)          # 16-row alignment for bf16 sublane packing
    tn = _fit(N, tn, 128)
    tk = _fit(K, tk, 128)
    grid = (M // tm, N // tn, K // tk)

    in_specs = [pl.BlockSpec((tm, tk), lambda i, j, kk: (i, kk)),
                pl.BlockSpec((tk, tn), lambda i, j, kk: (kk, j))]
    inputs = [x, w]
    if b is not None:
        in_specs.append(pl.BlockSpec((1, tn), lambda i, j, kk: (0, j)))
        inputs.append(b.reshape(1, N).astype(jnp.float32))
    if residual is not None:
        in_specs.append(pl.BlockSpec((tm, tn), lambda i, j, kk: (i, j)))
        inputs.append(residual)

    return pl.pallas_call(
        _make_matmul_kernel(b is not None, residual is not None),
        out_shape=jax.ShapeDtypeStruct((M, N), out_dtype),
        grid=grid, in_specs=in_specs,
        out_specs=pl.BlockSpec((tm, tn), lambda i, j, kk: (i, j)),
        scratch_shapes=[pltpu.VMEM((tm, tn), jnp.float32)],
        compiler_params=pltpu.CompilerParams(
            dimension_semantics=("parallel", "parallel", "arbitrary"),
            vmem_limit_bytes=_VMEM_LIMIT),
    )(*inputs)


# ----------------------------- RMSNorm ----------------------------------------

def _rmsnorm_kernel(x_ref, w_ref, o_ref, *, eps):
    x = x_ref[...].astype(jnp.float32)
    ms = jnp.mean(x * x, axis=-1, keepdims=True)
    o_ref[...] = (x * jax.lax.rsqrt(ms + eps) * w_ref[...]).astype(o_ref.dtype)


def rmsnorm(x2d, w, *, eps=1e-6, out_dtype=jnp.bfloat16):
    """x2d: [M, D] bf16, w: [D] f32 -> [M, D] bf16 (matches torch.nn.RMSNorm)."""
    M, D = x2d.shape
    tm = _fit(M, 256, 16)
    return pl.pallas_call(
        functools.partial(_rmsnorm_kernel, eps=eps),
        out_shape=jax.ShapeDtypeStruct((M, D), out_dtype),
        grid=(M // tm,),
        in_specs=[pl.BlockSpec((tm, D), lambda i: (i, 0)),
                  pl.BlockSpec((1, D), lambda i: (0, 0))],
        out_specs=pl.BlockSpec((tm, D), lambda i: (i, 0)),
        compiler_params=pltpu.CompilerParams(
            dimension_semantics=("parallel",),
            vmem_limit_bytes=_VMEM_LIMIT),
    )(x2d, w.reshape(1, D))


# ----------------------------- SwiGLU FFN -------------------------------------

def _ffn_kernel(x_ref, w1_ref, w2_ref, w3_ref, r_ref, o_ref, acc_ref):
    j = pl.program_id(1)

    @pl.when(j == 0)
    def _():
        acc_ref[...] = jnp.zeros_like(acc_ref)

    x = x_ref[...]                                               # [tm, D] bf16
    h1 = jnp.dot(x, w1_ref[...], preferred_element_type=jnp.float32)
    h2 = jnp.dot(x, w2_ref[...], preferred_element_type=jnp.float32)
    h = (h1 * jax.nn.sigmoid(h1)) * h2                           # silu(fc1)*fc2
    acc_ref[...] += jnp.dot(h.astype(jnp.bfloat16), w3_ref[...],
                            preferred_element_type=jnp.float32)

    @pl.when(j == pl.num_programs(1) - 1)
    def _():
        # fused residual: x = x + ff(norm2(x)); residual stream stays bf16
        o_ref[...] = (r_ref[...].astype(jnp.float32)
                      + acc_ref[...]).astype(o_ref.dtype)


def ffn(x2d, w1, w2, w3, residual, *, out_dtype=jnp.bfloat16, tm=256, tf=256):
    """Fused SwiGLU FFN + residual, tiled over rows (M) and hidden dim (F).
    tf=256 keeps the [tm, tf] f32 silu intermediates near the vreg file."""
    M, D = x2d.shape
    F = w1.shape[1]
    tm = _fit(M, tm, 16)
    tf = _fit(F, tf, 128)
    return pl.pallas_call(
        _ffn_kernel,
        out_shape=jax.ShapeDtypeStruct((M, D), out_dtype),
        grid=(M // tm, F // tf),
        in_specs=[pl.BlockSpec((tm, D), lambda i, j: (i, 0)),
                  pl.BlockSpec((D, tf), lambda i, j: (0, j)),
                  pl.BlockSpec((D, tf), lambda i, j: (0, j)),
                  pl.BlockSpec((tf, D), lambda i, j: (j, 0)),
                  pl.BlockSpec((tm, D), lambda i, j: (i, 0))],
        out_specs=pl.BlockSpec((tm, D), lambda i, j: (i, 0)),
        scratch_shapes=[pltpu.VMEM((tm, D), jnp.float32)],
        compiler_params=pltpu.CompilerParams(
            dimension_semantics=("parallel", "arbitrary"),
            vmem_limit_bytes=_VMEM_LIMIT),
    )(x2d, w1, w2, w3, residual)


# ----------------------------- attention --------------------------------------

def _attention_kernel(q_ref, k_ref, v_ref, sin_ref, o_ref, kr_ref, *,
                      scale, half, tq, gs):
    i = pl.program_id(2)

    # K-side RoPE hoisted out of the q-block loop: computed once per
    # (batch, kv-group) and reused by all S//tq q-blocks via VMEM scratch.
    @pl.when(i == 0)
    def _():
        k = k_ref[0, 0].astype(jnp.float32)                      # [S, HD]
        sk = sin_ref[...]                                        # [S, HD]
        # NOTE: faithful to the reference `compute_rope`, where `cos` is
        # overwritten by `sin` before use, so BOTH terms use sin:
        #   t*sin + rotate_half(t)*sin == (t + rotate_half(t)) * sin
        k2 = jnp.concatenate([-k[:, half:], k[:, :half]], axis=-1)
        kr_ref[...] = ((k + k2) * sk).astype(jnp.bfloat16)

    kr = kr_ref[...]                                             # [S, HD] bf16
    v = v_ref[0, 0]                                              # [S, HD] bf16
    S = kr.shape[0]

    # All GS query heads of this kv-group in ONE rope / QK^T / softmax / PV.
    q = q_ref[0].astype(jnp.float32)                             # [GS, tq, HD]
    hd = q.shape[-1]
    row0 = pl.multiple_of(i * tq, tq)
    sq = sin_ref[pl.ds(row0, tq), :]                             # [tq, HD] f32
    q2 = jnp.concatenate([-q[..., half:], q[..., :half]], axis=-1)
    qr = ((q + q2) * sq[None]).reshape(gs * tq, hd).astype(jnp.bfloat16)

    # QK^T contracting the last axis of both (no XLU transpose of K).
    s = jax.lax.dot_general(qr, kr, (((1,), (1,)), ((), ())),
                            preferred_element_type=jnp.float32)  # [GS*tq, S]

    # causal mask built once per q-block (shared by all GS heads)
    row = i * tq + jax.lax.broadcasted_iota(jnp.int32, (tq, S), 0)
    col = jax.lax.broadcasted_iota(jnp.int32, (tq, S), 1)
    neg = jnp.where(col > row, -jnp.inf, 0.0).astype(jnp.float32)
    neg = jnp.concatenate([neg] * gs, axis=0)                    # [GS*tq, S]

    s = (s + neg) * scale                       # mask, then scale (ref order)
    m = jnp.max(s, axis=-1, keepdims=True)
    e = jnp.exp(s - m)
    p = e * pl.reciprocal(jnp.sum(e, axis=-1, keepdims=True), approx=True)
    o = jnp.dot(p.astype(v.dtype), v, preferred_element_type=jnp.float32)
    o_ref[0] = o.reshape(gs, tq, hd).astype(o_ref.dtype)


def attention(q, k, v, sin, *, scale):
    """q: [B, NH, S, HD] bf16, k/v: [B, NKV, S, HD] bf16 (un-repeated GQA),
    sin: [S, HD] f32 -> [B, NH, S, HD] bf16."""
    B, NH, S, HD = q.shape
    NKV = k.shape[1]
    GS = NH // NKV
    tq = _fit(S, 256, 16)
    kern = functools.partial(_attention_kernel, scale=scale, half=HD // 2,
                             tq=tq, gs=GS)
    q_spec = pl.BlockSpec((1, GS, tq, HD), lambda b, g, i: (b, g, i, 0))
    kv_spec = pl.BlockSpec((1, 1, S, HD), lambda b, g, i: (b, g, 0, 0))
    # TODO(synk): long-context (v7x, 64 MiB VMEM) wants the KV axis flash-tiled
    # with online-softmax scratch instead of full-S K/V blocks.
    return pl.pallas_call(
        kern,
        out_shape=jax.ShapeDtypeStruct((B, NH, S, HD), jnp.bfloat16),
        grid=(B, NKV, S // tq),
        in_specs=[q_spec, kv_spec, kv_spec,
                  pl.BlockSpec((S, HD), lambda b, g, i: (0, 0))],
        out_specs=q_spec,
        scratch_shapes=[pltpu.VMEM((S, HD), jnp.bfloat16)],     # rotated K
        compiler_params=pltpu.CompilerParams(
            dimension_semantics=("parallel", "parallel", "arbitrary"),
            vmem_limit_bytes=_VMEM_LIMIT),
    )(q, k, v, sin)


# ----------------------------- model (glue) -----------------------------------

def precompute_rope(context_length, head_dim, rope_base):
    rope_dim = head_dim // 2
    j = jnp.arange(rope_dim, dtype=jnp.float32)
    thetas = 1.0 / rope_base ** (2.0 * j / rope_dim)
    positions = jnp.arange(context_length, dtype=jnp.float32)
    angles = positions[:, None] * thetas[None, :]
    angles = jnp.concatenate([angles, angles], axis=-1)
    return jnp.cos(angles), jnp.sin(angles)


def init_params(key, cfg):
    E = cfg['embed_dim']; V = cfg['vocab_size']
    NH = cfg['num_heads']; NKV = cfg['num_kv_groups']
    HD = cfg['head_dim']; F = cfg['ffn_dim']; L = cfg['num_layers']

    def nrm(k, shape, dtype=jnp.bfloat16):
        return (0.02 * jax.random.normal(k, shape, jnp.float32)).astype(dtype)

    keys = jax.random.split(key, 1 + L)
    tok_emb = 0.02 * jax.random.normal(keys[0], (V, E), jnp.float32)
    params = {
        'tok_emb': tok_emb,                              # f32 for the gather
        # tied LM head, stored pre-transposed [E, V] bf16 (no runtime transpose;
        # bf16 copy of the tied f32 embedding -- inference precision choice).
        'lm_head_w': tok_emb.T.astype(jnp.bfloat16),
        'final_norm_w': jnp.ones((E,), jnp.float32),
        'layers': [],
    }
    for li in range(L):
        lk = jax.random.split(keys[1 + li], 6)
        params['layers'].append({
            # fused q|k|v projection weight [E, (NH + 2*NKV)*HD] (qkv_bias=False)
            'wqkv': nrm(lk[0], (E, (NH + 2 * NKV) * HD)),
            'wo': nrm(lk[1], (NH * HD, NH * HD)),        # out_proj (has bias)
            'bo': nrm(lk[2], (NH * HD,), jnp.float32),
            'w1': nrm(lk[3], (E, F)),                    # fc1 (no bias)
            'w2': nrm(lk[4], (E, F)),                    # fc2 (no bias)
            'w3': nrm(lk[5], (F, E)),                    # fc3 (no bias)
            'norm1_w': jnp.ones((E,), jnp.float32),
            'norm2_w': jnp.ones((E,), jnp.float32),
        })
    return params


def llama32_forward(tokens, params, cfg, sin):
    B, S = tokens.shape
    E = cfg['embed_dim']; NH = cfg['num_heads']
    NKV = cfg['num_kv_groups']; HD = cfg['head_dim']
    scale = 1.0 / (HD ** 0.5)
    M = B * S

    # token embedding lookup (glue); residual stream kept in bf16
    x2d = jnp.take(params['tok_emb'], tokens, axis=0
                   ).astype(jnp.bfloat16).reshape(M, E)
    sin_s = sin[:S]

    # TODO(synk): reference calls `self.trf_blocks(x, x)` (nn.Sequential with 2
    # args -> TypeError) and `self.head_dim` (missing attr); implemented as the
    # obviously intended single-arg sequential / params.head_dim.
    for layer in params['layers']:
        # --- attention sub-block: x = x + out_proj(att(norm1(x))) ---
        h = rmsnorm(x2d, layer['norm1_w'])                        # bf16
        qkv = matmul(h, layer['wqkv'], out_dtype=jnp.bfloat16)    # fused q|k|v
        # TODO(synk): head split/merge transposes kept as XLA glue; folding
        # them into the attention BlockSpecs needs GS*HD % 128 == 0 (true for
        # production head counts, not for this tiny demo config).
        q = qkv[:, :NH * HD].reshape(B, S, NH, HD).transpose(0, 2, 1, 3)
        k = qkv[:, NH * HD:(NH + NKV) * HD].reshape(B, S, NKV, HD
                                                    ).transpose(0, 2, 1, 3)
        v = qkv[:, (NH + NKV) * HD:].reshape(B, S, NKV, HD).transpose(0, 2, 1, 3)
        y = attention(q, k, v, sin_s, scale=scale)                # [B,NH,S,HD]
        y2d = y.transpose(0, 2, 1, 3).reshape(M, NH * HD)
        # out-proj (bias) with the residual add fused into its finalize
        x2d = matmul(y2d, layer['wo'], layer['bo'], residual=x2d,
                     out_dtype=jnp.bfloat16)

        # --- feed-forward sub-block: x = x + ff(norm2(x)), residual fused ---
        h2 = rmsnorm(x2d, layer['norm2_w'])
        x2d = ffn(h2, layer['w1'], layer['w2'], layer['w3'], x2d)

    xn = rmsnorm(x2d, params['final_norm_w'])                     # bf16
    # tied LM head (pre-transposed [E, V]); wide lane-dense N tiles, full-K
    logits = matmul(xn, params['lm_head_w'], out_dtype=jnp.float32,
                    tn=512, tk=max(512, E))
    return logits.reshape(B, S, -1)


# --------------------------------- main ----------------------------------------

if __name__ == "__main__":
    cfg = dict(
        vocab_size=128,
        embed_dim=32,
        att_dim=32,
        num_heads=4,
        num_kv_groups=2,
        head_dim=8,            # embed_dim // num_heads
        context_length=8,
        rope_base=10000.0,
        ffn_dim=64,
        num_layers=2,
        qkv_bias=False,
        dropout=0.0,           # dropout is never applied in the reference forward
    )
    key = jax.random.PRNGKey(0)
    pkey, tkey = jax.random.split(key)
    params = init_params(pkey, cfg)
    tokens = jax.random.randint(
        tkey, (2, cfg['context_length']), 0, cfg['vocab_size'], dtype=jnp.int32)
    _cos, sin = precompute_rope(cfg['context_length'], cfg['head_dim'],
                                cfg['rope_base'])

    fwd = jax.jit(lambda toks, ps: llama32_forward(toks, ps, cfg, sin))
    logits = fwd(tokens, params)
    jax.block_until_ready(logits)
    assert logits.shape == (2, cfg['context_length'], cfg['vocab_size'])
    assert logits.dtype == jnp.float32
    print("KERNEL_OK")
</pallas_src>

<mosaic_0001>
module attributes {stable_mosaic.version = 11 : i64} {
  func.func @_rmsnorm_kernel(%arg0: i32, %arg1: memref<16x32xbf16, #tpu.memory_space<vmem>>, %arg2: memref<1x32xf32, #tpu.memory_space<vmem>>, %arg3: memref<16x32xbf16, #tpu.memory_space<vmem>>) attributes {dimension_semantics = [#tpu.dimension_semantics<parallel>], iteration_bounds = array<i64: 1>, scalar_prefetch = 0 : i64, scratch_operands = 0 : i64, tpu.core_type = #tpu.core_type<tc>, window_params = [{transform_indices = @transform_0, window_bounds = array<i64: 16, 32>}, {pipeline_mode = #tpu.pipeline_mode<synchronous>, transform_indices = @transform_1, window_bounds = array<i64: 1, 32>}, {transform_indices = @transform_2, window_bounds = array<i64: 16, 32>}]} {
    %c0 = arith.constant 0 : index
    %c0_0 = arith.constant 0 : index
    %0 = vector.load %arg1[%c0, %c0_0] : memref<16x32xbf16, #tpu.memory_space<vmem>>, vector<16x32xbf16>
    %1 = arith.extf %0 : vector<16x32xbf16> to vector<16x32xf32>
    %2 = arith.mulf %1, %1 : vector<16x32xf32>
    %cst = arith.constant dense<0.000000e+00> : vector<16xf32>
    %3 = vector.multi_reduction <add>, %2, %cst [1] : vector<16x32xf32> to vector<16xf32>
    %4 = vector.shape_cast %3 : vector<16xf32> to vector<16x1xf32>
    %cst_1 = arith.constant 3.200000e+01 : f32
    %5 = vector.broadcast %cst_1 : f32 to vector<16x1xf32>
    %6 = arith.divf %4, %5 : vector<16x1xf32>
    %cst_2 = arith.constant 9.99999997E-7 : f32
    %7 = vector.broadcast %cst_2 : f32 to vector<16x1xf32>
    %8 = arith.addf %6, %7 : vector<16x1xf32>
    %9 = math.rsqrt %8 : vector<16x1xf32>
    %10 = vector.broadcast %9 : vector<16x1xf32> to vector<16x32xf32>
    %11 = arith.mulf %1, %10 : vector<16x32xf32>
    %c0_3 = arith.constant 0 : index
    %c0_4 = arith.constant 0 : index
    %12 = vector.load %arg2[%c0_3, %c0_4] : memref<1x32xf32, #tpu.memory_space<vmem>>, vector<1x32xf32>
    %13 = vector.broadcast %12 : vector<1x32xf32> to vector<16x32xf32>
    %14 = arith.mulf %11, %13 : vector<16x32xf32>
    %15 = arith.truncf %14 : vector<16x32xf32> to vector<16x32xbf16>
    %c0_5 = arith.constant 0 : index
    %c0_6 = arith.constant 0 : index
    %16 = vector.load %arg3[%c0_5, %c0_6] : memref<16x32xbf16, #tpu.memory_space<vmem>>, vector<16x32xbf16>
    tpu.vector_store %arg3[%c0_5, %c0_6], %15 {strides = array<i32>} : memref<16x32xbf16, #tpu.memory_space<vmem>>, vector<16x32xbf16>,
    return
  }
  func.func @transform_0(%arg0: i32) -> (i32, i32) {
    %c0_i32 = arith.constant 0 : i32
    %c0_i32_0 = arith.constant 0 : i32
    return %arg0, %c0_i32 : i32, i32
  }
  func.func @transform_1(%arg0: i32) -> (i32, i32) {
    %c0_i32 = arith.constant 0 : i32
    %c0_i32_0 = arith.constant 0 : i32
    %c0_i32_1 = arith.constant 0 : i32
    return %c0_i32, %c0_i32_0 : i32, i32
  }
  func.func @transform_2(%arg0: i32) -> (i32, i32) {
    %c0_i32 = arith.constant 0 : i32
    %c0_i32_0 = arith.constant 0 : i32
    return %arg0, %c0_i32 : i32, i32
  }
}

module attributes {stable_mosaic.version = 11 : i64} {
  func.func @kernel(%arg0: i32, %arg1: i32, %arg2: i32, %arg3: memref<16x32xbf16, #tpu.memory_space<vmem>>, %arg4: memref<32x64xbf16, #tpu.memory_space<vmem>>, %arg5: memref<16x64xbf16, #tpu.memory_space<vmem>>, %arg6: memref<16x64xf32, #tpu.memory_space<vmem>>) attributes {dimension_semantics = [#tpu.dimension_semantics<parallel>, #tpu.dimension_semantics<parallel>, #tpu.dimension_semantics<arbitrary>], iteration_bounds = array<i64: 1, 1, 1>, scalar_prefetch = 0 : i64, scratch_operands = 1 : i64, tpu.core_type = #tpu.core_type<tc>, window_params = [{transform_indices = @transform_0, window_bounds = array<i64: 16, 32>}, {transform_indices = @transform_1, window_bounds = array<i64: 32, 64>}, {transform_indices = @transform_2, window_bounds = array<i64: 16, 64>}]} {
    %c0_i32 = arith.constant 0 : i32
    %0 = arith.cmpi eq, %arg2, %c0_i32 : i32
    %1 = arith.extui %0 : i1 to i32
    %c0_i32_0 = arith.constant 0 : i32
    %2 = arith.cmpi ne, %1, %c0_i32_0 : i32
    scf.if %2 {
      %cst_10 = arith.constant 0.000000e+00 : f32
      %12 = vector.broadcast %cst_10 : f32 to vector<16x64xf32>
      %c0_11 = arith.constant 0 : index
      %c0_12 = arith.constant 0 : index
      %13 = vector.load %arg6[%c0_11, %c0_12] : memref<16x64xf32, #tpu.memory_space<vmem>>, vector<16x64xf32>
      tpu.vector_store %arg6[%c0_11, %c0_12], %12 {strides = array<i32>} : memref<16x64xf32, #tpu.memory_space<vmem>>, vector<16x64xf32>,
    } else {
    }
    %c0 = arith.constant 0 : index
    %c0_1 = arith.constant 0 : index
    %3 = vector.load %arg6[%c0, %c0_1] : memref<16x64xf32, #tpu.memory_space<vmem>>, vector<16x64xf32>
    %c0_2 = arith.constant 0 : index
    %c0_3 = arith.constant 0 : index
    %4 = vector.load %arg3[%c0_2, %c0_3] : memref<16x32xbf16, #tpu.memory_space<vmem>>, vector<16x32xbf16>
    %c0_4 = arith.constant 0 : index
    %c0_5 = arith.constant 0 : index
    %5 = vector.load %arg4[%c0_4, %c0_5] : memref<32x64xbf16, #tpu.memory_space<vmem>>, vector<32x64xbf16>
    %cst = arith.constant dense<0.000000e+00> : vector<16x64xf32>
    %6 = tpu.matmul %4, %5, %cst {dimension_numbers = #tpu.dot_dimension_numbers<[1], [0], [0], [1], [0, 0, 1, 1], [], []>} : vector<16x32xbf16>, vector<32x64xbf16>, vector<16x64xf32> -> vector<16x64xf32>
    %7 = arith.addf %3, %6 : vector<16x64xf32>
    %c0_6 = arith.constant 0 : index
    %c0_7 = arith.constant 0 : index
    %8 = vector.load %arg6[%c0_6, %c0_7] : memref<16x64xf32, #tpu.memory_space<vmem>>, vector<16x64xf32>
    tpu.vector_store %arg6[%c0_6, %c0_7], %7 {strides = array<i32>} : memref<16x64xf32, #tpu.memory_space<vmem>>, vector<16x64xf32>,
    %c0_i32_8 = arith.constant 0 : i32
    %9 = arith.cmpi eq, %arg2, %c0_i32_8 : i32
    %10 = arith.extui %9 : i1 to i32
    %c0_i32_9 = arith.constant 0 : i32
    %11 = arith.cmpi ne, %10, %c0_i32_9 : i32
    scf.if %11 {
      %c0_10 = arith.constant 0 : index
      %c0_11 = arith.constant 0 : index
      %12 = vector.load %arg6[%c0_10, %c0_11] : memref<16x64xf32, #tpu.memory_space<vmem>>, vector<16x64xf32>
      %13 = arith.truncf %12 : vector<16x64xf32> to vector<16x64xbf16>
      %c0_12 = arith.constant 0 : index
      %c0_13 = arith.constant 0 : index
      %14 = vector.load %arg5[%c0_12, %c0_13] : memref<16x64xbf16, #tpu.memory_space<vmem>>, vector<16x64xbf16>
      tpu.vector_store %arg5[%c0_12, %c0_13], %13 {strides = array<i32>} : memref<16x64xbf16, #tpu.memory_space<vmem>>, vector<16x64xbf16>,
    } else {
    }
    return
  }
  func.func @transform_0(%arg0: i32, %arg1: i32, %arg2: i32) -> (i32, i32) {
    %c0_i32 = arith.constant 0 : i32
    return %arg0, %arg2 : i32, i32
  }
  func.func @transform_1(%arg0: i32, %arg1: i32, %arg2: i32) -> (i32, i32) {
    %c0_i32 = arith.constant 0 : i32
    return %arg2, %arg1 : i32, i32
  }
  func.func @transform_2(%arg0: i32, %arg1: i32, %arg2: i32) -> (i32, i32) {
    %c0_i32 = arith.constant 0 : i32
    return %arg0, %arg1 : i32, i32
  }
}

module attributes {stable_mosaic.version = 11 : i64} {
  func.func @kernel(%arg0: i32, %arg1: i32, %arg2: i32, %arg3: memref<16x32xbf16, #tpu.memory_space<vmem>>, %arg4: memref<32x32xbf16, #tpu.memory_space<vmem>>, %arg5: memref<1x32xf32, #tpu.memory_space<vmem>>, %arg6: memref<16x32xbf16, #tpu.memory_space<vmem>>, %arg7: memref<16x32xbf16, #tpu.memory_space<vmem>>, %arg8: memref<16x32xf32, #tpu.memory_space<vmem>>) attributes {dimension_semantics = [#tpu.dimension_semantics<parallel>, #tpu.dimension_semantics<parallel>, #tpu.dimension_semantics<arbitrary>], iteration_bounds = array<i64: 1, 1, 1>, scalar_prefetch = 0 : i64, scratch_operands = 1 : i64, tpu.core_type = #tpu.core_type<tc>, window_params = [{transform_indices = @transform_0, window_bounds = array<i64: 16, 32>}, {transform_indices = @transform_1, window_bounds = array<i64: 32, 32>}, {transform_indices = @transform_2, window_bounds = array<i64: 1, 32>}, {transform_indices = @transform_3, window_bounds = array<i64: 16, 32>}, {transform_indices = @transform_4, window_bounds = array<i64: 16, 32>}]} {
    %c0_i32 = arith.constant 0 : i32
    %0 = arith.cmpi eq, %arg2, %c0_i32 : i32
    %1 = arith.extui %0 : i1 to i32
    %c0_i32_0 = arith.constant 0 : i32
    %2 = arith.cmpi ne, %1, %c0_i32_0 : i32
    scf.if %2 {
      %cst_10 = arith.constant 0.000000e+00 : f32
      %12 = vector.broadcast %cst_10 : f32 to vector<16x32xf32>
      %c0_11 = arith.constant 0 : index
      %c0_12 = arith.constant 0 : index
      %13 = vector.load %arg8[%c0_11, %c0_12] : memref<16x32xf32, #tpu.memory_space<vmem>>, vector<16x32xf32>
      tpu.vector_store %arg8[%c0_11, %c0_12], %12 {strides = array<i32>} : memref<16x32xf32, #tpu.memory_space<vmem>>, vector<16x32xf32>,
    } else {
    }
    %c0 = arith.constant 0 : index
    %c0_1 = arith.constant 0 : index
    %3 = vector.load %arg8[%c0, %c0_1] : memref<16x32xf32, #tpu.memory_space<vmem>>, vector<16x32xf32>
    %c0_2 = arith.constant 0 : index
    %c0_3 = arith.constant 0 : index
    %4 = vector.load %arg3[%c0_2, %c0_3] : memref<16x32xbf16, #tpu.memory_space<vmem>>, vector<16x32xbf16>
    %c0_4 = arith.constant 0 : index
    %c0_5 = arith.constant 0 : index
    %5 = vector.load %arg4[%c0_4, %c0_5] : memref<32x32xbf16, #tpu.memory_space<vmem>>, vector<32x32xbf16>
    %cst = arith.constant dense<0.000000e+00> : vector<16x32xf32>
    %6 = tpu.matmul %4, %5, %cst {dimension_numbers = #tpu.dot_dimension_numbers<[1], [0], [0], [1], [0, 0, 1, 1], [], []>} : vector<16x32xbf16>, vector<32x32xbf16>, vector<16x32xf32> -> vector<16x32xf32>
    %7 = arith.addf %3, %6 : vector<16x32xf32>
    %c0_6 = arith.constant 0 : index
    %c0_7 = arith.constant 0 : index
    %8 = vector.load %arg8[%c0_6, %c0_7] : memref<16x32xf32, #tpu.memory_space<vmem>>, vector<16x32xf32>
    tpu.vector_store %arg8[%c0_6, %c0_7], %7 {strides = array<i32>} : memref<16x32xf32, #tpu.memory_space<vmem>>, vector<16x32xf32>,
    %c0_i32_8 = arith.constant 0 : i32
    %9 = arith.cmpi eq, %arg2, %c0_i32_8 : i32
    %10 = arith.extui %9 : i1 to i32
    %c0_i32_9 = arith.constant 0 : i32
    %11 = arith.cmpi ne, %10, %c0_i32_9 : i32
    scf.if %11 {
      %c0_10 = arith.constant 0 : index
      %c0_11 = arith.constant 0 : index
      %12 = vector.load %arg8[%c0_10, %c0_11] : memref<16x32xf32, #tpu.memory_space<vmem>>, vector<16x32xf32>
      %c0_12 = arith.constant 0 : index
      %c0_13 = arith.constant 0 : index
      %13 = vector.load %arg5[%c0_12, %c0_13] : memref<1x32xf32, #tpu.memory_space<vmem>>, vector<1x32xf32>
      %14 = vector.broadcast %13 : vector<1x32xf32> to vector<16x32xf32>
      %15 = arith.addf %12, %14 : vector<16x32xf32>
      %c0_14 = arith.constant 0 : index
      %c0_15 = arith.constant 0 : index
      %16 = vector.load %arg6[%c0_14, %c0_15] : memref<16x32xbf16, #tpu.memory_space<vmem>>, vector<16x32xbf16>
      %17 = arith.extf %16 : vector<16x32xbf16> to vector<16x32xf32>
      %18 = arith.addf %15, %17 : vector<16x32xf32>
      %19 = arith.truncf %18 : vector<16x32xf32> to vector<16x32xbf16>
      %c0_16 = arith.constant 0 : index
      %c0_17 = arith.constant 0 : index
      %20 = vector.load %arg7[%c0_16, %c0_17] : memref<16x32xbf16, #tpu.memory_space<vmem>>, vector<16x32xbf16>
      tpu.vector_store %arg7[%c0_16, %c0_17], %19 {strides = array<i32>} : memref<16x32xbf16, #tpu.memory_space<vmem>>, vector<16x32xbf16>,
    } else {
    }
    return
  }
  func.func @transform_0(%arg0: i32, %arg1: i32, %arg2: i32) -> (i32, i32) {
    %c0_i32 = arith.constant 0 : i32
    return %arg0, %arg2 : i32, i32
  }
  func.func @transform_1(%arg0: i32, %arg1: i32, %arg2: i32) -> (i32, i32) {
    %c0_i32 = arith.constant 0 : i32
    return %arg2, %arg1 : i32, i32
  }
  func.func @transform_2(%arg0: i32, %arg1: i32, %arg2: i32) -> (i32, i32) {
    %c0_i32 = arith.constant 0 : i32
    %c0_i32_0 = arith.constant 0 : i32
    return %c0_i32, %arg1 : i32, i32
  }
  func.func @transform_3(%arg0: i32, %arg1: i32, %arg2: i32) -> (i32, i32) {
    %c0_i32 = arith.constant 0 : i32
    return %arg0, %arg1 : i32, i32
  }
  func.func @transform_4(%arg0: i32, %arg1: i32, %arg2: i32) -> (i32, i32) {
    %c0_i32 = arith.constant 0 : i32
    return %arg0, %arg1 : i32, i32
  }
}

module attributes {stable_mosaic.version = 11 : i64} {
  func.func @_attention_kernel(%arg0: i32, %arg1: i32, %arg2: i32, %arg3: memref<1x2x8x8xbf16, #tpu.memory_space<vmem>>, %arg4: memref<1x1x8x8xbf16, #tpu.memory_space<vmem>>, %arg5: memref<1x1x8x8xbf16, #tpu.memory_space<vmem>>, %arg6: memref<8x8xf32, #tpu.memory_space<vmem>>, %arg7: memref<1x2x8x8xbf16, #tpu.memory_space<vmem>>, %arg8: memref<8x8xbf16, #tpu.memory_space<vmem>>) attributes {dimension_semantics = [#tpu.dimension_semantics<parallel>, #tpu.dimension_semantics<parallel>, #tpu.dimension_semantics<arbitrary>], iteration_bounds = array<i64: 2, 2, 1>, scalar_prefetch = 0 : i64, scratch_operands = 1 : i64, tpu.core_type = #tpu.core_type<tc>, window_params = [{transform_indices = @transform_0, window_bounds = array<i64: 1, 2, 8, 8>}, {transform_indices = @transform_1, window_bounds = array<i64: 1, 1, 8, 8>}, {transform_indices = @transform_2, window_bounds = array<i64: 1, 1, 8, 8>}, {pipeline_mode = #tpu.pipeline_mode<synchronous>, transform_indices = @transform_3, window_bounds = array<i64: 8, 8>}, {transform_indices = @transform_4, window_bounds = array<i64: 1, 2, 8, 8>}]} {
    %c0_i32 = arith.constant 0 : i32
    %0 = arith.cmpi eq, %arg2, %c0_i32 : i32
    %1 = arith.extui %0 : i1 to i32
    %c0_i32_0 = arith.constant 0 : i32
    %2 = arith.cmpi ne, %1, %c0_i32_0 : i32
    scf.if %2 {
      %c0_23 = arith.constant 0 : index
      %c0_24 = arith.constant 0 : index
      %c0_25 = arith.constant 0 : index
      %c0_26 = arith.constant 0 : index
      %55 = vector.load %arg4[%c0_23, %c0_24, %c0_25, %c0_26] : memref<1x1x8x8xbf16, #tpu.memory_space<vmem>>, vector<1x1x8x8xbf16>
      %56 = vector.shape_cast %55 : vector<1x1x8x8xbf16> to vector<8x8xbf16>
      %57 = arith.extf %56 : vector<8x8xbf16> to vector<8x8xf32>
      %c0_27 = arith.constant 0 : index
      %c0_28 = arith.constant 0 : index
      %58 = vector.load %arg6[%c0_27, %c0_28] : memref<8x8xf32, #tpu.memory_space<vmem>>, vector<8x8xf32>
      %59 = vector.extract_strided_slice %57 {offsets = [0, 4], sizes = [8, 4], strides = [1, 1]} : vector<8x8xf32> to vector<8x4xf32>
      %cst_29 = arith.constant 0.000000e+00 : f32
      %60 = vector.broadcast %cst_29 : f32 to vector<8x4xf32>
      %61 = arith.subf %60, %59 : vector<8x4xf32>
      %62 = vector.extract_strided_slice %57 {offsets = [0, 0], sizes = [8, 4], strides = [1, 1]} : vector<8x8xf32> to vector<8x4xf32>
      %63 = tpu.concatenate %61, %62 in 1 : vector<8x4xf32>, vector<8x4xf32> -> vector<8x8xf32>
      %64 = arith.addf %57, %63 : vector<8x8xf32>
      %65 = arith.mulf %64, %58 : vector<8x8xf32>
      %66 = arith.truncf %65 : vector<8x8xf32> to vector<8x8xbf16>
      %c0_30 = arith.constant 0 : index
      %c0_31 = arith.constant 0 : index
      %67 = vector.load %arg8[%c0_30, %c0_31] : memref<8x8xbf16, #tpu.memory_space<vmem>>, vector<8x8xbf16>
      tpu.vector_store %arg8[%c0_30, %c0_31], %66 {strides = array<i32>} : memref<8x8xbf16, #tpu.memory_space<vmem>>, vector<8x8xbf16>,
    } else {
    }
    %c0 = arith.constant 0 : index
    %c0_1 = arith.constant 0 : index
    %3 = vector.load %arg8[%c0, %c0_1] : memref<8x8xbf16, #tpu.memory_space<vmem>>, vector<8x8xbf16>
    %c0_2 = arith.constant 0 : index
    %c0_3 = arith.constant 0 : index
    %c0_4 = arith.constant 0 : index
    %c0_5 = arith.constant 0 : index
    %4 = vector.load %arg5[%c0_2, %c0_3, %c0_4, %c0_5] : memref<1x1x8x8xbf16, #tpu.memory_space<vmem>>, vector<1x1x8x8xbf16>
    %5 = vector.shape_cast %4 : vector<1x1x8x8xbf16> to vector<8x8xbf16>
    %c0_6 = arith.constant 0 : index
    %c0_7 = arith.constant 0 : index
    %c0_8 = arith.constant 0 : index
    %c0_9 = arith.constant 0 : index
    %6 = vector.load %arg3[%c0_6, %c0_7, %c0_8, %c0_9] : memref<1x2x8x8xbf16, #tpu.memory_space<vmem>>, vector<1x2x8x8xbf16>
    %7 = vector.shape_cast %6 : vector<1x2x8x8xbf16> to vector<2x8x8xbf16>
    %8 = arith.extf %7 : vector<2x8x8xbf16> to vector<2x8x8xf32>
    %c8_i32 = arith.constant 8 : i32
    %9 = arith.muli %arg2, %c8_i32 : i32
    %10 = tpu.assume_multiple %9, 8 : i32
    %11 = arith.index_cast %10 : i32 to index
    %c0_10 = arith.constant 0 : index
    %12 = vector.load %arg6[%11, %c0_10] : memref<8x8xf32, #tpu.memory_space<vmem>>, vector<8x8xf32>
    %13 = vector.extract_strided_slice %8 {offsets = [0, 0, 4], sizes = [2, 8, 4], strides = [1, 1, 1]} : vector<2x8x8xf32> to vector<2x8x4xf32>
    %cst = arith.constant 0.000000e+00 : f32
    %14 = vector.broadcast %cst : f32 to vector<2x8x4xf32>
    %15 = arith.subf %14, %13 : vector<2x8x4xf32>
    %16 = vector.extract_strided_slice %8 {offsets = [0, 0, 0], sizes = [2, 8, 4], strides = [1, 1, 1]} : vector<2x8x8xf32> to vector<2x8x4xf32>
    %17 = tpu.concatenate %15, %16 in 2 : vector<2x8x4xf32>, vector<2x8x4xf32> -> vector<2x8x8xf32>
    %18 = arith.addf %8, %17 : vector<2x8x8xf32>
    %19 = vector.shape_cast %12 : vector<8x8xf32> to vector<1x8x8xf32>
    %20 = vector.broadcast %19 : vector<1x8x8xf32> to vector<2x8x8xf32>
    %21 = arith.mulf %18, %20 : vector<2x8x8xf32>
    %22 = vector.shape_cast %21 : vector<2x8x8xf32> to vector<16x8xf32>
    %23 = arith.truncf %22 : vector<16x8xf32> to vector<16x8xbf16>
    %cst_11 = arith.constant dense<0.000000e+00> : vector<16x8xf32>
    %24 = tpu.matmul %23, %3, %cst_11 {dimension_numbers = #tpu.dot_dimension_numbers<[1], [1], [0], [0], [0, 0, 1, 0], [], []>} : vector<16x8xbf16>, vector<8x8xbf16>, vector<16x8xf32> -> vector<16x8xf32>
    %c8_i32_12 = arith.constant 8 : i32
    %25 = arith.muli %arg2, %c8_i32_12 : i32
    %26 = tpu.iota {dimensions = array<i32: 0>} : vector<8x8xi32>
    %27 = vector.broadcast %25 : i32 to vector<8x8xi32>
    %28 = arith.addi %27, %26 : vector<8x8xi32>
    %29 = tpu.iota {dimensions = array<i32: 1>} : vector<8x8xi32>
    %30 = arith.cmpi sgt, %29, %28 : vector<8x8xi32>
    %cst_13 = arith.constant 0xFF800000 : f32
    %cst_14 = arith.constant 0.000000e+00 : f32
    %31 = vector.broadcast %cst_13 : f32 to vector<8x8xf32>
    %32 = vector.broadcast %cst_14 : f32 to vector<8x8xf32>
    %33 = arith.select %30, %31, %32 : vector<8x8xi1>, vector<8x8xf32>
    %34 = tpu.concatenate %33, %33 in 0 : vector<8x8xf32>, vector<8x8xf32> -> vector<16x8xf32>
    %35 = arith.addf %24, %34 : vector<16x8xf32>
    %cst_15 = arith.constant 0.353553385 : f32
    %36 = vector.broadcast %cst_15 : f32 to vector<16x8xf32>
    %37 = arith.mulf %35, %36 : vector<16x8xf32>
    %cst_16 = arith.constant dense<0xFF800000> : vector<16xf32>
    %38 = vector.multi_reduction <maximumf>, %37, %cst_16 [1] : vector<16x8xf32> to vector<16xf32>
    %39 = vector.shape_cast %38 : vector<16xf32> to vector<16x1xf32>
    %40 = vector.broadcast %39 : vector<16x1xf32> to vector<16x8xf32>
    %41 = arith.subf %37, %40 : vector<16x8xf32>
    %42 = math.exp %41 : vector<16x8xf32>
    %cst_17 = arith.constant dense<0.000000e+00> : vector<16xf32>
    %43 = vector.multi_reduction <add>, %42, %cst_17 [1] : vector<16x8xf32> to vector<16xf32>
    %44 = vector.shape_cast %43 : vector<16xf32> to vector<16x1xf32>
    %45 = tpu.reciprocal %44 {approx = true} : vector<16x1xf32> -> vector<16x1xf32>
    %46 = vector.broadcast %45 : vector<16x1xf32> to vector<16x8xf32>
    %47 = arith.mulf %42, %46 : vector<16x8xf32>
    %48 = arith.truncf %47 : vector<16x8xf32> to vector<16x8xbf16>
    %cst_18 = arith.constant dense<0.000000e+00> : vector<16x8xf32>
    %49 = tpu.matmul %48, %5, %cst_18 {dimension_numbers = #tpu.dot_dimension_numbers<[1], [0], [0], [1], [0, 0, 1, 1], [], []>} : vector<16x8xbf16>, vector<8x8xbf16>, vector<16x8xf32> -> vector<16x8xf32>
    %50 = vector.shape_cast %49 : vector<16x8xf32> to vector<2x8x8xf32>
    %51 = arith.truncf %50 : vector<2x8x8xf32> to vector<2x8x8xbf16>
    %c0_19 = arith.constant 0 : index
    %c0_20 = arith.constant 0 : index
    %c0_21 = arith.constant 0 : index
    %c0_22 = arith.constant 0 : index
    %52 = vector.load %arg7[%c0_19, %c0_20, %c0_21, %c0_22] : memref<1x2x8x8xbf16, #tpu.memory_space<vmem>>, vector<1x2x8x8xbf16>
    %53 = vector.shape_cast %52 : vector<1x2x8x8xbf16> to vector<2x8x8xbf16>
    %54 = vector.shape_cast %51 : vector<2x8x8xbf16> to vector<1x2x8x8xbf16>
    tpu.vector_store %arg7[%c0_19, %c0_20, %c0_21, %c0_22], %54 {strides = array<i32>} : memref<1x2x8x8xbf16, #tpu.memory_space<vmem>>, vector<1x2x8x8xbf16>,
    return
  }
  func.func @transform_0(%arg0: i32, %arg1: i32, %arg2: i32) -> (i32, i32, i32, i32) {
    %c0_i32 = arith.constant 0 : i32
    %c0_i32_0 = arith.constant 0 : i32
    return %arg0, %arg1, %arg2, %c0_i32 : i32, i32, i32, i32
  }
  func.func @transform_1(%arg0: i32, %arg1: i32, %arg2: i32) -> (i32, i32, i32, i32) {
    %c0_i32 = arith.constant 0 : i32
    %c0_i32_0 = arith.constant 0 : i32
    %c0_i32_1 = arith.constant 0 : i32
    return %arg0, %arg1, %c0_i32, %c0_i32_0 : i32, i32, i32, i32
  }
  func.func @transform_2(%arg0: i32, %arg1: i32, %arg2: i32) -> (i32, i32, i32, i32) {
    %c0_i32 = arith.constant 0 : i32
    %c0_i32_0 = arith.constant 0 : i32
    %c0_i32_1 = arith.constant 0 : i32
    return %arg0, %arg1, %c0_i32, %c0_i32_0 : i32, i32, i32, i32
  }
  func.func @transform_3(%arg0: i32, %arg1: i32, %arg2: i32) -> (i32, i32) {
    %c0_i32 = arith.constant 0 : i32
    %c0_i32_0 = arith.constant 0 : i32
    %c0_i32_1 = arith.constant 0 : i32
    return %c0_i32, %c0_i32_0 : i32, i32
  }
  func.func @transform_4(%arg0: i32, %arg1: i32, %arg2: i32) -> (i32, i32, i32, i32) {
    %c0_i32 = arith.constant 0 : i32
    %c0_i32_0 = arith.constant 0 : i32
    return %arg0, %arg1, %arg2, %c0_i32 : i32, i32, i32, i32
  }
}

module attributes {stable_mosaic.version = 11 : i64} {
  func.func @_ffn_kernel(%arg0: i32, %arg1: i32, %arg2: memref<16x32xbf16, #tpu.memory_space<vmem>>, %arg3: memref<32x64xbf16, #tpu.memory_space<vmem>>, %arg4: memref<32x64xbf16, #tpu.memory_space<vmem>>, %arg5: memref<64x32xbf16, #tpu.memory_space<vmem>>, %arg6: memref<16x32xbf16, #tpu.memory_space<vmem>>, %arg7: memref<16x32xbf16, #tpu.memory_space<vmem>>, %arg8: memref<16x32xf32, #tpu.memory_space<vmem>>) attributes {dimension_semantics = [#tpu.dimension_semantics<parallel>, #tpu.dimension_semantics<arbitrary>], iteration_bounds = array<i64: 1, 1>, scalar_prefetch = 0 : i64, scratch_operands = 1 : i64, tpu.core_type = #tpu.core_type<tc>, window_params = [{transform_indices = @transform_0, window_bounds = array<i64: 16, 32>}, {transform_indices = @transform_1, window_bounds = array<i64: 32, 64>}, {transform_indices = @transform_2, window_bounds = array<i64: 32, 64>}, {transform_indices = @transform_3, window_bounds = array<i64: 64, 32>}, {transform_indices = @transform_4, window_bounds = array<i64: 16, 32>}, {transform_indices = @transform_5, window_bounds = array<i64: 16, 32>}]} {
    %c0_i32 = arith.constant 0 : i32
    %0 = arith.cmpi eq, %arg1, %c0_i32 : i32
    %1 = arith.extui %0 : i1 to i32
    %c0_i32_0 = arith.constant 0 : i32
    %2 = arith.cmpi ne, %1, %c0_i32_0 : i32
    scf.if %2 {
      %cst_17 = arith.constant 0.000000e+00 : f32
      %24 = vector.broadcast %cst_17 : f32 to vector<16x32xf32>
      %c0_18 = arith.constant 0 : index
      %c0_19 = arith.constant 0 : index
      %25 = vector.load %arg8[%c0_18, %c0_19] : memref<16x32xf32, #tpu.memory_space<vmem>>, vector<16x32xf32>
      tpu.vector_store %arg8[%c0_18, %c0_19], %24 {strides = array<i32>} : memref<16x32xf32, #tpu.memory_space<vmem>>, vector<16x32xf32>,
    } else {
    }
    %c0 = arith.constant 0 : index
    %c0_1 = arith.constant 0 : index
    %3 = vector.load %arg2[%c0, %c0_1] : memref<16x32xbf16, #tpu.memory_space<vmem>>, vector<16x32xbf16>
    %c0_2 = arith.constant 0 : index
    %c0_3 = arith.constant 0 : index
    %4 = vector.load %arg3[%c0_2, %c0_3] : memref<32x64xbf16, #tpu.memory_space<vmem>>, vector<32x64xbf16>
    %cst = arith.constant dense<0.000000e+00> : vector<16x64xf32>
    %5 = tpu.matmul %3, %4, %cst {dimension_numbers = #tpu.dot_dimension_numbers<[1], [0], [0], [1], [0, 0, 1, 1], [], []>} : vector<16x32xbf16>, vector<32x64xbf16>, vector<16x64xf32> -> vector<16x64xf32>
    %c0_4 = arith.constant 0 : index
    %c0_5 = arith.constant 0 : index
    %6 = vector.load %arg4[%c0_4, %c0_5] : memref<32x64xbf16, #tpu.memory_space<vmem>>, vector<32x64xbf16>
    %cst_6 = arith.constant dense<0.000000e+00> : vector<16x64xf32>
    %7 = tpu.matmul %3, %6, %cst_6 {dimension_numbers = #tpu.dot_dimension_numbers<[1], [0], [0], [1], [0, 0, 1, 1], [], []>} : vector<16x32xbf16>, vector<32x64xbf16>, vector<16x64xf32> -> vector<16x64xf32>
    %8 = arith.negf %5 : vector<16x64xf32>
    %9 = math.exp %8 : vector<16x64xf32>
    %cst_7 = arith.constant 1.000000e+00 : f32
    %10 = vector.broadcast %cst_7 : f32 to vector<16x64xf32>
    %11 = arith.addf %10, %9 : vector<16x64xf32>
    %12 = arith.divf %10, %11 : vector<16x64xf32>
    %13 = arith.mulf %5, %12 : vector<16x64xf32>
    %14 = arith.mulf %13, %7 : vector<16x64xf32>
    %c0_8 = arith.constant 0 : index
    %c0_9 = arith.constant 0 : index
    %15 = vector.load %arg8[%c0_8, %c0_9] : memref<16x32xf32, #tpu.memory_space<vmem>>, vector<16x32xf32>
    %16 = arith.truncf %14 : vector<16x64xf32> to vector<16x64xbf16>
    %c0_10 = arith.constant 0 : index
    %c0_11 = arith.constant 0 : index
    %17 = vector.load %arg5[%c0_10, %c0_11] : memref<64x32xbf16, #tpu.memory_space<vmem>>, vector<64x32xbf16>
    %cst_12 = arith.constant dense<0.000000e+00> : vector<16x32xf32>
    %18 = tpu.matmul %16, %17, %cst_12 {dimension_numbers = #tpu.dot_dimension_numbers<[1], [0], [0], [1], [0, 0, 1, 1], [], []>} : vector<16x64xbf16>, vector<64x32xbf16>, vector<16x32xf32> -> vector<16x32xf32>
    %19 = arith.addf %15, %18 : vector<16x32xf32>
    %c0_13 = arith.constant 0 : index
    %c0_14 = arith.constant 0 : index
    %20 = vector.load %arg8[%c0_13, %c0_14] : memref<16x32xf32, #tpu.memory_space<vmem>>, vector<16x32xf32>
    tpu.vector_store %arg8[%c0_13, %c0_14], %19 {strides = array<i32>} : memref<16x32xf32, #tpu.memory_space<vmem>>, vector<16x32xf32>,
    %c0_i32_15 = arith.constant 0 : i32
    %21 = arith.cmpi eq, %arg1, %c0_i32_15 : i32
    %22 = arith.extui %21 : i1 to i32
    %c0_i32_16 = arith.constant 0 : i32
    %23 = arith.cmpi ne, %22, %c0_i32_16 : i32
    scf.if %23 {
      %c0_17 = arith.constant 0 : index
      %c0_18 = arith.constant 0 : index
      %24 = vector.load %arg6[%c0_17, %c0_18] : memref<16x32xbf16, #tpu.memory_space<vmem>>, vector<16x32xbf16>
      %25 = arith.extf %24 : vector<16x32xbf16> to vector<16x32xf32>
      %c0_19 = arith.constant 0 : index
      %c0_20 = arith.constant 0 : index
      %26 = vector.load %arg8[%c0_19, %c0_20] : memref<16x32xf32, #tpu.memory_space<vmem>>, vector<16x32xf32>
      %27 = arith.addf %25, %26 : vector<16x32xf32>
      %28 = arith.truncf %27 : vector<16x32xf32> to vector<16x32xbf16>
      %c0_21 = arith.constant 0 : index
      %c0_22 = arith.constant 0 : index
      %29 = vector.load %arg7[%c0_21, %c0_22] : memref<16x32xbf16, #tpu.memory_space<vmem>>, vector<16x32xbf16>
      tpu.vector_store %arg7[%c0_21, %c0_22], %28 {strides = array<i32>} : memref<16x32xbf16, #tpu.memory_space<vmem>>, vector<16x32xbf16>,
    } else {
    }
    return
  }
  func.func @transform_0(%arg0: i32, %arg1: i32) -> (i32, i32) {
    %c0_i32 = arith.constant 0 : i32
    %c0_i32_0 = arith.constant 0 : i32
    return %arg0, %c0_i32 : i32, i32
  }
  func.func @transform_1(%arg0: i32, %arg1: i32) -> (i32, i32) {
    %c0_i32 = arith.constant 0 : i32
    %c0_i32_0 = arith.constant 0 : i32
    return %c0_i32, %arg1 : i32, i32
  }
  func.func @transform_2(%arg0: i32, %arg1: i32) -> (i32, i32) {
    %c0_i32 = arith.constant 0 : i32
    %c0_i32_0 = arith.constant 0 : i32
    return %c0_i32, %arg1 : i32, i32
  }
  func.func @transform_3(%arg0: i32, %arg1: i32) -> (i32, i32) {
    %c0_i32 = arith.constant 0 : i32
    %c0_i32_0 = arith.constant 0 : i32
    return %arg1, %c0_i32 : i32, i32
  }
  func.func @transform_4(%arg0: i32, %arg1: i32) -> (i32, i32) {
    %c0_i32 = arith.constant 0 : i32
    %c0_i32_0 = arith.constant 0 : i32
    return %arg0, %c0_i32 : i32, i32
  }
  func.func @transform_5(%arg0: i32, %arg1: i32) -> (i32, i32) {
    %c0_i32 = arith.constant 0 : i32
    %c0_i32_0 = arith.constant 0 : i32
    return %arg0, %c0_i32 : i32, i32
  }
}

module attributes {stable_mosaic.version = 11 : i64} {
  func.func @kernel(%arg0: i32, %arg1: i32, %arg2: i32, %arg3: memref<16x32xbf16, #tpu.memory_space<vmem>>, %arg4: memref<32x128xbf16, #tpu.memory_space<vmem>>, %arg5: memref<16x128xf32, #tpu.memory_space<vmem>>, %arg6: memref<16x128xf32, #tpu.memory_space<vmem>>) attributes {dimension_semantics = [#tpu.dimension_semantics<parallel>, #tpu.dimension_semantics<parallel>, #tpu.dimension_semantics<arbitrary>], iteration_bounds = array<i64: 1, 1, 1>, scalar_prefetch = 0 : i64, scratch_operands = 1 : i64, tpu.core_type = #tpu.core_type<tc>, window_params = [{transform_indices = @transform_0, window_bounds = array<i64: 16, 32>}, {transform_indices = @transform_1, window_bounds = array<i64: 32, 128>}, {transform_indices = @transform_2, window_bounds = array<i64: 16, 128>}]} {
    %c0_i32 = arith.constant 0 : i32
    %0 = arith.cmpi eq, %arg2, %c0_i32 : i32
    %1 = arith.extui %0 : i1 to i32
    %c0_i32_0 = arith.constant 0 : i32
    %2 = arith.cmpi ne, %1, %c0_i32_0 : i32
    scf.if %2 {
      %cst_10 = arith.constant 0.000000e+00 : f32
      %12 = vector.broadcast %cst_10 : f32 to vector<16x128xf32>
      %c0_11 = arith.constant 0 : index
      %c0_12 = arith.constant 0 : index
      %13 = vector.load %arg6[%c0_11, %c0_12] : memref<16x128xf32, #tpu.memory_space<vmem>>, vector<16x128xf32>
      tpu.vector_store %arg6[%c0_11, %c0_12], %12 {strides = array<i32>} : memref<16x128xf32, #tpu.memory_space<vmem>>, vector<16x128xf32>,
    } else {
    }
    %c0 = arith.constant 0 : index
    %c0_1 = arith.constant 0 : index
    %3 = vector.load %arg6[%c0, %c0_1] : memref<16x128xf32, #tpu.memory_space<vmem>>, vector<16x128xf32>
    %c0_2 = arith.constant 0 : index
    %c0_3 = arith.constant 0 : index
    %4 = vector.load %arg3[%c0_2, %c0_3] : memref<16x32xbf16, #tpu.memory_space<vmem>>, vector<16x32xbf16>
    %c0_4 = arith.constant 0 : index
    %c0_5 = arith.constant 0 : index
    %5 = vector.load %arg4[%c0_4, %c0_5] : memref<32x128xbf16, #tpu.memory_space<vmem>>, vector<32x128xbf16>
    %cst = arith.constant dense<0.000000e+00> : vector<16x128xf32>
    %6 = tpu.matmul %4, %5, %cst {dimension_numbers = #tpu.dot_dimension_numbers<[1], [0], [0], [1], [0, 0, 1, 1], [], []>} : vector<16x32xbf16>, vector<32x128xbf16>, vector<16x128xf32> -> vector<16x128xf32>
    %7 = arith.addf %3, %6 : vector<16x128xf32>
    %c0_6 = arith.constant 0 : index
    %c0_7 = arith.constant 0 : index
    %8 = vector.load %arg6[%c0_6, %c0_7] : memref<16x128xf32, #tpu.memory_space<vmem>>, vector<16x128xf32>
    tpu.vector_store %arg6[%c0_6, %c0_7], %7 {strides = array<i32>} : memref<16x128xf32, #tpu.memory_space<vmem>>, vector<16x128xf32>,
    %c0_i32_8 = arith.constant 0 : i32
    %9 = arith.cmpi eq, %arg2, %c0_i32_8 : i32
    %10 = arith.extui %9 : i1 to i32
    %c0_i32_9 = arith.constant 0 : i32
    %11 = arith.cmpi ne, %10, %c0_i32_9 : i32
    scf.if %11 {
      %c0_10 = arith.constant 0 : index
      %c0_11 = arith.constant 0 : index
      %12 = vector.load %arg6[%c0_10, %c0_11] : memref<16x128xf32, #tpu.memory_space<vmem>>, vector<16x128xf32>
      %c0_12 = arith.constant 0 : index
      %c0_13 = arith.constant 0 : index
      %13 = vector.load %arg5[%c0_12, %c0_13] : memref<16x128xf32, #tpu.memory_space<vmem>>, vector<16x128xf32>
      tpu.vector_store %arg5[%c0_12, %c0_13], %12 {strides = array<i32>} : memref<16x128xf32, #tpu.memory_space<vmem>>, vector<16x128xf32>,
    } else {
    }
    return
  }
  func.func @transform_0(%arg0: i32, %arg1: i32, %arg2: i32) -> (i32, i32) {
    %c0_i32 = arith.constant 0 : i32
    return %arg0, %arg2 : i32, i32
  }
  func.func @transform_1(%arg0: i32, %arg1: i32, %arg2: i32) -> (i32, i32) {
    %c0_i32 = arith.constant 0 : i32
    return %arg2, %arg1 : i32, i32
  }
  func.func @transform_2(%arg0: i32, %arg1: i32, %arg2: i32) -> (i32, i32) {
    %c0_i32 = arith.constant 0 : i32
    return %arg0, %arg1 : i32, i32
  }
}

</mosaic_0001>

<bundles_post_ra>
// kernel: _lambda_.14
= control target key start
LH: loop header
LB: loop body
LE: loop exit
PB: predicated region body
PF: predicated region fallthrough
CT: control target
= control target key end

     0   :  { %vm17_vm0 = vcmask 261120   ;;  %vm50_vm1 = vcmask 257024   ;;  %s97_s0 = inlined_call_operand.vmem [shape: bf16[16,32], index: 0, kind: input, shape index: {}]   ;;  %s98_s1 = inlined_call_operand.vmem [shape: f32[1,32], index: 1, kind: input, shape index: {}]   ;;  %s99_s2 = inlined_call_operand.vmem [shape: bf16[16,32], index: 2, kind: output, shape index: {}]  }
   0x1   :  { %v63_v0 = vld [vmem:[%s97_s0] sm:$0xff]  }
   0x2   :  { %v64_v1 = vunpack.c.l.bf16 %v63_v0  ;;  %v65_v2 = vunpack.c.h.bf16 %v63_v0  ;;  %v57_v14 = vld [vmem:[%s98_s1] ss:$0 sm:$0xff] }
   0x4   :  { %v15_v3 = vmul.f32 %v64_v1, %v64_v1  ;;  %v16_v4 = vmul.f32 %v65_v2, %v65_v2 }
   0x6   :  { %v18_v5 = vsel %vm17_vm0, %v15_v3, 0.0  ;;  %v21_v6 = vsel %vm17_vm0, %v16_v4, 0.0 }
   0x7   :  { %19 = vadd.xlane.f32.xlu0 %v18_v5 }
   0xb   :  { %22 = vadd.xlane.f32.xlu0 %v21_v6 }
  0x94   :  { %v20_v7 = vpop.xlane.xlu0 %19 }
  0x95   :  { %v25_v8 = vmul.f32 0.03125, %v20_v7 }
  0x97   :  { %v27_v9 = vadd.f32 1e-06, %v25_v8 }
  0x98   :  { %v23_v10 = vpop.xlane.xlu0 %22 }
  0x99   :  { %66 = vrsqrt.f32 %v27_v9  ;;  %v26_v11 = vmul.f32 0.03125, %v23_v10 }
  0x9b   :  { %v28_v12 = vadd.f32 1e-06, %v26_v11 }
  0x9d   :  { %68 = vrsqrt.f32 %v28_v12 }
  0xa3   :  { %v67_v13 = vpop.eup %66 }
  0xa4   :  { %v31_v15 = vmul.f32 %v67_v13, %v64_v1 }
  0xa6   :  { %v40_v16 = vmul.f32 %v57_v14, %v31_v15 }
  0xa7   :  { %v69_v17 = vpop.eup %68 }
  0xa8   :  { %v60_v18 = vpack.c.bf16 %v40_v16, %v40_v16  ;;  %v32_v19 = vmul.f32 %v69_v17, %v65_v2 }
  0xaa   :  { %51 = vst.msk [vmem:[%s99_s2] sm:$0xf] %vm50_vm1, %v60_v18  ;;  %v41_v20 = vmul.f32 %v57_v14, %v32_v19 }
  0xac   :  { %v61_v21 = vpack.c.bf16 %v41_v20, %v41_v20 }
  0xae   :  { %52 = vst.msk [vmem:[%s99_s2 + $0x4] sm:$0xf] %vm50_vm1, %v61_v21 }

// kernel: _lambda_.15
= control target key start
LH: loop header
LB: loop body
LE: loop exit
PB: predicated region body
PF: predicated region fallthrough
CT: control target
= control target key end

     0   :  { %vm16_vm0 = vcmask 523264   ;;  %v138_v0 = vmov 0.0   ;;  %vm139_vm1 = vmmov 0   ;;  %vm44_vm2 = vcmask 261120   ;;  %s174_s1 = inlined_call_operand.vmem [shape: bf16[32,64], index: 1, kind: input, shape index: {}]   ;;  %s175_s0 = inlined_call_operand.vmem [shape: bf16[16,32], index: 0, kind: input, shape index: {}]   ;;  %s176_s2 = inlined_call_operand.vmem [shape: bf16[16,64], index: 2, kind: output, shape index: {}]  }
   0x1   :  { %125 = vmatprep.subr.bf16.mxu0 %v138_v0  ;;  %v135_v1 = vld [vmem:[%s174_s1] sm:$0xff]   ;;  %129 = vmatprep.mubr.msk.bf16.mxu0 %vm139_vm1, %v138_v0  ;;  %17 = vst.msk [vmem:[#allocation2] sm:$0xff] %vm16_vm0, %v138_v0  ;;  %18 = vst.msk [vmem:[#allocation2 + $0x8] sm:$0xff] %vm16_vm0, %v138_v0  ;;  %v136_v2 = vld [vmem:[%s174_s1 + $0x8] sm:$0xff]   ;;  %vm107_vm3 = vcmask 519168  }
   0x2   :  { %126 = vmatpush3.bf16.msra.mxu0 %v135_v1  ;;  %v137_v3 = vld [vmem:[%s175_s0] sm:$0xff]  }
   0x3   :  { %127 = vmatprep.subr.bf16.mxu0 %v138_v0 }
   0x6   :  { %128 = vmatpush3.bf16.msra.mxu0 %v136_v2 }
   0x8   :  { %v19_v4 = vld [vmem:[#allocation2] sm:$0xff]  ;;  %v20_v6 = vld [vmem:[#allocation2 + $0x8] sm:$0xff] }
   0x9   :  { %130 = vmatmul.mubr.msk.bf16.vlgmr.msra.gmra.mrb[0].mxu0 %vm44_vm2, %v137_v3 }
  0xdc   :  { %v82_v5 = vpop.f32.mrb[0].mxu0 }
  0xdd   :  { %v89_v7 = vadd.f32 %v82_v5, %v19_v4  ;;  %v131_v8 = vpop.f32.mrb[1].mxu0 }
  0xde   :  { %v85_v9 = vpop.f32.mrb[2].mxu0 }
  0xdf   :  { %92 = vst.msk [vmem:[#allocation2] sm:$0xff] %vm16_vm0, %v89_v7  ;;  %v90_v10 = vadd.f32 %v85_v9, %v20_v6  ;;  %v132_v11 = vpop.f32.mrb[3].mxu0 }
  0xe1   :  { %93 = vst.msk [vmem:[#allocation2 + $0x8] sm:$0xff] %vm16_vm0, %v90_v10 }
  0xe6   :  { %v97_v12 = vld [vmem:[#allocation2] sm:$0xff] }
  0xe7   :  { %v120_v13 = vpack.c.bf16 %v97_v12, %v97_v12 }
  0xe8   :  { %v98_v14 = vld [vmem:[#allocation2 + $0x8] sm:$0xff] }
  0xe9   :  { %108 = vst.msk [vmem:[%s176_s2] sm:$0xf] %vm107_vm3, %v120_v13  ;;  %v121_v15 = vpack.c.bf16 %v98_v14, %v98_v14 }
  0xeb   :  { %109 = vst.msk [vmem:[%s176_s2 + $0x4] sm:$0xf] %vm107_vm3, %v121_v15 }

// kernel: _lambda_.17
= control target key start
LH: loop header
LB: loop body
LE: loop exit
PB: predicated region body
PF: predicated region fallthrough
CT: control target
= control target key end

     0   :  { %vm22_vm0 = vcmask 261120   ;;  %v163_v0 = vmov 0.0   ;;  %vm164_vm1 = vmmov 0   ;;  %vm127_vm2 = vcmask 257024   ;;  %s216_s1 = inlined_call_operand.vmem [shape: bf16[32,32], index: 1, kind: input, shape index: {}]   ;;  %s217_s0 = inlined_call_operand.vmem [shape: bf16[16,32], index: 0, kind: input, shape index: {}]   ;;  %s218_s3 = inlined_call_operand.vmem [shape: bf16[16,32], index: 3, kind: input, shape index: {}]   ;;  %s219_s2 = inlined_call_operand.vmem [shape: f32[1,32], index: 2, kind: input, shape index: {}]   ;;  %s220_s4 = inlined_call_operand.vmem [shape: bf16[16,32], index: 4, kind: output, shape index: {}]  }
   0x1   :  { %150 = vmatprep.subr.bf16.mxu0 %v163_v0  ;;  %v160_v1 = vld [vmem:[%s216_s1] sm:$0xff]   ;;  %154 = vmatprep.mubr.msk.bf16.mxu0 %vm164_vm1, %v163_v0  ;;  %23 = vst.msk [vmem:[#allocation2] sm:$0xff] %vm22_vm0, %v163_v0  ;;  %24 = vst.msk [vmem:[#allocation2 + $0x8] sm:$0xff] %vm22_vm0, %v163_v0  ;;  %v161_v2 = vld [vmem:[%s216_s1 + $0x8] sm:$0xff]  }
   0x2   :  { %151 = vmatpush3.bf16.msra.mxu0 %v160_v1  ;;  %v162_v3 = vld [vmem:[%s217_s0] sm:$0xff]  }
   0x3   :  { %152 = vmatprep.subr.bf16.mxu0 %v163_v0  ;;  %v144_v12 = vld [vmem:[%s218_s3] sm:$0xff]  }
   0x4   :  { %v138_v13 = vld [vmem:[%s219_s2] ss:$0 sm:$0xff]  ;;  %v145_v14 = vunpack.c.l.bf16 %v144_v12  ;;  %v146_v17 = vunpack.c.h.bf16 %v144_v12 }
   0x6   :  { %153 = vmatpush3.bf16.msra.mxu0 %v161_v2 }
   0x8   :  { %v25_v4 = vld [vmem:[#allocation2] sm:$0xff]  ;;  %v26_v6 = vld [vmem:[#allocation2 + $0x8] sm:$0xff] }
   0x9   :  { %155 = vmatmul.mubr.msk.bf16.vlgmr.msra.gmra.mrb[0].mxu0 %vm22_vm0, %v162_v3 }
  0xdc   :  { %v88_v5 = vpop.f32.mrb[0].mxu0 }
  0xdd   :  { %v95_v7 = vadd.f32 %v88_v5, %v25_v4  ;;  %v156_v8 = vpop.f32.mrb[1].mxu0 }
  0xde   :  { %v91_v9 = vpop.f32.mrb[2].mxu0 }
  0xdf   :  { %97 = vst.msk [vmem:[#allocation2] sm:$0xff] %vm22_vm0, %v95_v7  ;;  %v96_v10 = vadd.f32 %v91_v9, %v26_v6  ;;  %v157_v11 = vpop.f32.mrb[3].mxu0 }
  0xe1   :  { %98 = vst.msk [vmem:[#allocation2 + $0x8] sm:$0xff] %vm22_vm0, %v96_v10 }
  0xe6   :  { %v102_v15 = vld [vmem:[#allocation2] sm:$0xff] }
  0xe7   :  { %v111_v16 = vadd.f32 %v138_v13, %v102_v15 }
  0xe8   :  { %v103_v18 = vld [vmem:[#allocation2 + $0x8] sm:$0xff] }
  0xe9   :  { %v117_v19 = vadd.f32 %v145_v14, %v111_v16  ;;  %v112_v20 = vadd.f32 %v138_v13, %v103_v18 }
  0xeb   :  { %v141_v21 = vpack.c.bf16 %v117_v19, %v117_v19  ;;  %v118_v22 = vadd.f32 %v146_v17, %v112_v20 }
  0xed   :  { %128 = vst.msk [vmem:[%s220_s4] sm:$0xf] %vm127_vm2, %v141_v21  ;;  %v142_v23 = vpack.c.bf16 %v118_v22, %v118_v22 }
  0xef   :  { %129 = vst.msk [vmem:[%s220_s4 + $0x4] sm:$0xf] %vm127_vm2, %v142_v23 }

// kernel: _lambda_.16
= control target key start
LH: loop header
LB: loop body
LE: loop exit
PB: predicated region body
PF: predicated region fallthrough
CT: control target
= control target key end

     0   :  { %s827_s15 = smov 0   ;;  %s829_s16 = smov 0   ;;  %s911_s0 = inlined_call_operand.vmem [shape: bf16[2,4,8,8], index: 0, kind: input, shape index: {}]   ;;  %s912_s1 = inlined_call_operand.vmem [shape: bf16[2,2,8,8], index: 1, kind: input, shape index: {}]   ;;  %s913_s2 = inlined_call_operand.vmem [shape: bf16[2,2,8,8], index: 2, kind: input, shape index: {}]   ;;  %s914_s3 = inlined_call_operand.vmem [shape: f32[8,8], index: 3, kind: input, shape index: {}]   ;;  %s915_s4 = inlined_call_operand.vmem [shape: bf16[2,4,8,8], index: 4, kind: output, shape index: {}]  }
   0x1   :  { %s831_s17 = smov 0   ;;  %s833_s18 = smov 0  }
   0x2   :  { %s835_s19 = smov 0  }
   0x3 LB: > { %s29_s20 = sadd.s32 1, %s788_s17  ;;  %s33_s21 = sadd.s32 1, %s792_s18  ;;  %s796_s19 = sphi %s835_s19, %s14_s19   ;;  %s792_s18 = sphi %s833_s18, %s919_s18   ;;  %s788_s17 = sphi %s831_s17, %s918_s17   ;;  %s784_s16 = sphi %s829_s16, %s917_s16   ;;  %s780_s15 = sphi %s827_s15, %s916_s15  }
   0x4   : > { %p31_p0 = scmp.ge.s32.totalorder %s29_s20, 2  ;;  %p666_p1 = scmp.ge.s32.totalorder %s796_s19, 1 }
   0x5   : > { %p227_p2 = scmp.lt.s32.totalorder %s796_s19, 5 }
   0x6   : > { %s921_s20 = smov (%p31_p0, %s29_s20), 0  ;;  %s923_s21 = smov (!%p31_p0, %s33_s21), %s792_s18 }
   0x7   : > { %p228_p3 = pnand %p666_p1, %p227_p2  ;;  %p35_p4 = scmp.ge.s32.totalorder %s923_s21, 2 }
   0x8   : > { %p284_p5 = scmp.lt.s32.totalorder (!%p228_p3), %s784_s16, 1  ;;  %p298_p6 = scmp.lt.s32.totalorder (!%p228_p3), %s780_s15, 1  ;;  %v799_v7 = vmov (!%p228_p3), 0.0   ;;  %vm801_vm0 = vmmov (!%p228_p3), 0   ;;  %vm342_vm1 = vcmask (!%p228_p3), 31744   ;;  %v332_v12 = vld [vmem:[%s914_s3] sm:$0xff] (!%p228_p3)  ;;  %v384_v31 = vlaneseq (!%p228_p3) }
   0x9   : > { %s925_s21 = smov (%p35_p4, %s923_s21), 0  ;;  %231 = sbr.rel (%p228_p3) target bundleno = 920 (0x398), region = 36 }
   0xa   : > { %s667_s24 = sshll.u32 (!%p228_p3), %s780_s15, 1  ;;  %s798_s10 = smov (!%p228_p3), 124   ;;  %689 = vmatprep.subr.bf16.mxu0 (!%p228_p3), %v799_v7  ;;  %695 = vmatprep.subr.bf16.mxu1 (!%p228_p3), %v799_v7  ;;  %vm347_vm2 = vcmask (!%p228_p3), 60416   ;;  %vm392_vm3 = vcmask (!%p228_p3), 64512   ;;  %v385_v32 = vshrl.u32 (!%p228_p3), %v384_v31, 7  ;;  %v389_v33 = vand.u32 (!%p228_p3), 127, %v384_v31 }
   0xb   : > { %p286_p7 = scmp.lt.s32.totalorder (!%p228_p3), %s667_s24, 3  ;;  %s800_s11 = smov (!%p228_p3), 4   ;;  %691 = vmatprep.mubr.msk.bf16.mxu0 (!%p228_p3), %vm801_vm0, %v799_v7  ;;  %697 = vmatprep.mubr.msk.bf16.mxu1 (!%p228_p3), %vm801_vm0, %v799_v7  ;;  %vm468_vm5 = vcmask (!%p228_p3), 1043456  }
   0xc   : > { %vm390_vm4 = vcmp.gt.s32.totalorder (!%p228_p3), %v389_v33, %v385_v32 }
   0xd   : > { %v391_v34 = vsel (!%p228_p3), %vm390_vm4, -inf, %v799_v7 }
  0x10   : > { %s927_s16 = smov (!%p284_p5, %s784_s16), 1  ;;  %s929_s24 = smov (!%p286_p7, %s667_s24), 3 }
  0x11   : > { %s299_s22 = scalar_select %p298_p6, %s780_s15, 1 }
  0x12   : > { %s670_s23 = sshll.u32 %s927_s16, 1  ;;  %s668_s30 = sshll.u32 %s927_s16, 2 }
  0x13   : > { %s857_s25 = sadd.s32 %s670_s23, %s299_s22  ;;  %s865_s5 = sadd.s32 %s668_s30, %s929_s24 }
  0x14   : > { %s671_s26 = sshll.u32 %s857_s25, 2  ;;  %s669_s6 = sshll.u32 %s865_s5, 2 }
  0x15   : > { %s303_s29 = scalar_lea.vmem %s912_s1, %s671_s26  ;;  %s294_s9 = scalar_lea.vmem %s911_s0, %s669_s6 }
  0x16   : > { %v330_v0 = vld [vmem:[%s303_s29] sm:$0xf]  ;;  %s311_s16 = scalar_lea.vmem %s913_s2, %s671_s26  ;;  %s323_s24 = scalar_lea.vmem %s915_s4, %s669_s6 }
  0x17   : > { %v331_v1 = vunpack.c.l.bf16 %v330_v0  ;;  %v682_v3 = vld [vmem:[%s294_s9] sm:$0xff]  }
  0x18   : > { %v683_v4 = vunpack.c.l.bf16 %v682_v3  ;;  %v684_v5 = vunpack.c.h.bf16 %v682_v3  ;;  %v350_v55 = vld [vmem:[%s311_s16] sm:$0xf] }
  0x19   : > { %v333_v2 = vsub.f32 0.0, %v331_v1  ;;  %v470_v56 = vsel %vm468_vm5, %v350_v55, 0 }
  0x1a   : > { %v358_v6 = vsub.f32 0.0, %v683_v4  ;;  %v745_v8 = vpack.i.bf16 %v684_v5, %v683_v4  ;;  %v359_v9 = vsub.f32 0.0, %v684_v5  ;;  %696 = vmatpush3.bf16.msra.mxu1 %v470_v56 }
  0x1b   : > { %335 = vrot.lane.b32.xlu0 %v333_v2, %s798_s10 }
  0x1c   : > { %362 = vrot.lane.b32.xlu1 %v358_v6, %s798_s10 }
  0x1f   : > { %339 = vrot.lane.b32.xlu0 %v331_v1, %s800_s11 }
  0x20   : > { %364 = vrot.lane.b32.xlu1 %v359_v9, %s798_s10 }
  0x23   : > { %746 = vrot.lane.b32.xlu0 %v745_v8, %s800_s11 }
  0x8d   : > { %v336_v10 = vpop.permute.xlu0 %335 }
  0x8e   : > { %v363_v15 = vpop.permute.xlu1 %362 }
  0x91   : > { %v340_v11 = vpop.permute.xlu0 %339 }
  0x92   : > { %v343_v13 = vsel %vm342_vm1, %v336_v10, %v340_v11  ;;  %v365_v21 = vpop.permute.xlu1 %364 }
  0x93   : > { %v344_v14 = vadd.f32 %v343_v13, %v331_v1 }
  0x95   : > { %v345_v16 = vmul.f32 %v344_v14, %v332_v12  ;;  %v747_v17 = vpop.permute.xlu0 %746 }
  0x96   : > { %v749_v19 = vunpack.i.h.bf16 %v747_v17  ;;  %v748_v20 = vunpack.i.l.bf16 %v747_v17 }
  0x97   : > { %v346_v18 = vpack.c.bf16 %v345_v16, %v345_v16 }
  0x98   : > { %v377_v22 = vsel %vm342_vm1, %v363_v15, %v748_v20  ;;  %v378_v23 = vsel %vm342_vm1, %v365_v21, %v749_v19 }
  0x99   : > { %348 = vst.msk [vmem:[#allocation2] sm:$0xf] %vm347_vm2, %v346_v18  ;;  %v379_v24 = vadd.f32 %v683_v4, %v377_v22  ;;  %v380_v25 = vadd.f32 %v684_v5, %v378_v23 }
  0x9b   : > { %v381_v28 = vmul.f32 %v379_v24, %v332_v12  ;;  %v382_v29 = vmul.f32 %v380_v25, %v332_v12 }
  0x9d   : > { %v383_v30 = vpack.c.bf16 %v382_v29, %v381_v28 }
  0xa0   : > { %v349_v26 = vld [vmem:[#allocation2] sm:$0xf] }
  0xa1   : > { %v397_v27 = vsel %vm392_vm3, %v349_v26, 0 }
  0xa2   : > { %690 = vmatpush3.bf16.xpose.msra.mxu0 %v397_v27 }
  0xa9   : > { %692 = vmatmul.mubr.msk.bf16.vlgmr.msra.gmra.mrb[0].mxu0 %vm392_vm3, %v383_v30 }
 0x17c   : > { %v433_v35 = vpop.f32.mrb[0].mxu0 }
 0x17d   : > { %v434_v36 = vadd.f32 %v433_v35, %v391_v34  ;;  %v693_v37 = vpop.f32.mrb[1].mxu0 }
 0x17e   : > { %v436_v38 = vpop.f32.mrb[2].mxu0 }
 0x17f   : > { %v440_v39 = vmul.f32 0.35355338, %v434_v36  ;;  %v437_v40 = vadd.f32 %v436_v38, %v391_v34  ;;  %v694_v41 = vpop.f32.mrb[3].mxu0 }
 0x181   : > { %v441_v42 = vmul.f32 0.35355338, %v437_v40  ;;  %v442_v43 = vsel %vm392_vm3, %v440_v39, -inf }
 0x182   : > { %443 = vmax.xlane.f32.xlu1 %v442_v43 }
 0x183   : > { %v445_v44 = vsel %vm392_vm3, %v441_v42, -inf }
 0x184   : > { %446 = vmax.xlane.f32.xlu0 %v445_v44 }
 0x20f   : > { %v444_v45 = vpop.xlane.xlu1 %443 }
 0x210   : > { %v448_v46 = vsub.f32 %v440_v39, %v444_v45 }
 0x211   : > { %v447_v47 = vpop.xlane.xlu0 %446 }
 0x212   : > { %v450_v48 = vmul.f32 1.442695, %v448_v46  ;;  %v449_v49 = vsub.f32 %v441_v42, %v447_v47 }
 0x214   : > { %750 = vpow2.f32 %v450_v48  ;;  %v452_v50 = vmul.f32 1.442695, %v449_v49 }
 0x216   : > { %752 = vpow2.f32 %v452_v50 }
 0x21e   : > { %v751_v51 = vpop.eup %750 }
 0x21f   : > { %v454_v52 = vsel %vm392_vm3, %v751_v51, 0.0 }
 0x220   : > { %v753_v53 = vpop.eup %752  ;;  %455 = vadd.xlane.f32.xlu0 %v454_v52 }
 0x221   : > { %v457_v54 = vsel %vm392_vm3, %v753_v53, 0.0 }
 0x222   : > { %458 = vadd.xlane.f32.xlu1 %v457_v54 }
 0x2ad   : > { %v456_v57 = vpop.xlane.xlu0 %455 }
 0x2ae   : > { %754 = vrcp.f32 %v456_v57 }
 0x2af   : > { %v459_v58 = vpop.xlane.xlu1 %458 }
 0x2b0   : > { %756 = vrcp.f32 %v459_v58 }
 0x2b8   : > { %v755_v59 = vpop.eup %754 }
 0x2b9   : > { %v462_v61 = vmul.f32 %v755_v59, %v751_v51 }
 0x2ba   : > { %v757_v60 = vpop.eup %756 }
 0x2bb   : > { %v463_v62 = vmul.f32 %v757_v60, %v753_v53 }
 0x2bd   : > { %v464_v63 = vpack.c.bf16 %v463_v62, %v462_v61 }
 0x2bf   : > { %698 = vmatmul.mubr.msk.bf16.vlgmr.msra.gmra.mrb[0].mxu1 %vm392_vm3, %v464_v63 }
 0x392   : > { %v506_v0 = vpop.f32.mrb[0].mxu1 }
 0x393   : > { %v513_v1 = vpack.c.bf16 %v506_v0, %v506_v0  ;;  %v699_v2 = vpop.f32.mrb[1].mxu1 }
 0x394   : > { %v509_v3 = vpop.f32.mrb[2].mxu1 }
 0x395   : > { %516 = vst.msk [vmem:[%s323_s24] sm:$0xf] %vm347_vm2, %v513_v1  ;;  %v514_v4 = vpack.c.bf16 %v509_v3, %v509_v3  ;;  %v700_v5 = vpop.f32.mrb[3].mxu1 }
 0x397   : > { %517 = vst.msk [vmem:[%s323_s24 + $0x4] sm:$0xf] %vm347_vm2, %v514_v4 }
 0x398 PF: > { %s14_s19 = sadd.s32 1, %s796_s19   ;;  %s916_s15 = smov %s788_s17 }
 0x399   : > { %p11_p8 = scmp.ge.s32.totalorder %s14_s19, 6   ;;  %s917_s16 = smov %s792_s18 }
 0x39a   : > { %s918_s17 = smov %s921_s20  ;;  %s919_s18 = smov %s925_s21 }
 0x39b   :  { %13 = sbr.rel (!%p11_p8) target bundleno = 3 (0x3), region = 77 }

// kernel: _lambda_.27
= control target key start
LH: loop header
LB: loop body
LE: loop exit
PB: predicated region body
PF: predicated region fallthrough
CT: control target
= control target key end

     0   :  { %v163_v1 = vmov 0.0   ;;  %vm164_vm0 = vmmov 0   ;;  %s204_s0 = inlined_call_operand.vmem [shape: bf16[16,32], index: 0, kind: input, shape index: {}]   ;;  %s205_s1 = inlined_call_operand.vmem [shape: bf16[32,128], index: 1, kind: input, shape index: {}]   ;;  %s206_s2 = inlined_call_operand.hbm [shape: f32[16,128], index: 2, kind: output, shape index: {}]  }
   0x1   :  { %v136_v0 = vld [vmem:[%s205_s1] sm:$0xff]   ;;  %123 = vmatprep.subr.bf16.mxu0 %v163_v1  ;;  %v137_v2 = vld [vmem:[%s205_s1 + $0x8] sm:$0xff]   ;;  %127 = vmatprep.mubr.msk.bf16.mxu0 %vm164_vm0, %v163_v1 }
   0x2   :  { %124 = vmatpush3.bf16.msra.mxu0 %v136_v0 }
   0x3   :  { %125 = vmatprep.subr.bf16.mxu0 %v163_v1 }
   0x4   :  { %7 = vsyncpa [#allocation4], 0  ;;  %v138_v3 = vld [vmem:[%s204_s0] sm:$0xff]   ;;  %vm44_vm1 = vcmask 261120   ;;  %s165_s15 = smov [#allocation3]  }
   0x5   :  { %s105_s16 = sshll.u32 %s165_s15, 4  ;;  %s106_s16 = int_to_ptr.vmem [resolvable:$true] %s105_s16 }
   0x6   :  { %126 = vmatpush3.bf16.msra.mxu0 %v137_v2  ;;  %s139_s1 = scalar_lea.vmem %s106_s16, 256  ;;  %p144_p1 = scmp.lt.s32.totalorder %s106_s16, %s106_s16 }
   0x7   :  { %p140_p0 = scmp.ne.s32.totalorder %s106_s16, %s139_s1  ;;  %p145_p2 = scmp.lt.s32.totalorder %s139_s1, %s139_s1 }
   0x9   :  { %128 = vmatmul.mubr.msk.bf16.vlgmr.msra.gmra.mrb[0].mxu0 %vm44_vm1, %v138_v3  ;;  %p146_p3 = por %p145_p2, %p144_p1 }
   0xb   :  { %p147_p4 = pnand %p146_p3, %p140_p0 }
  0xdc   :  { %v82_v4 = vpop.f32.mrb[0].mxu0 }
  0xdd   :  { %98 = vst [vmem:[#allocation3] sm:$0xff] %v82_v4  ;;  %v129_v5 = vpop.f32.mrb[1].mxu0 }
  0xde   :  { %v85_v6 = vpop.f32.mrb[2].mxu0 }
  0xdf   :  { %99 = vst [vmem:[#allocation3 + $0x8] sm:$0xff] %v85_v6  ;;  %v130_v7 = vpop.f32.mrb[3].mxu0 }
  0xe0   :  { %150 = shalt.err (!%p147_p4)
}
  0xe1   :  { %s151_s18 = scalar_lea.hbm %s206_s2, 256 }
  0xe2   :  { %p152_p5 = scmp.ne.s32.totalorder %s206_s2, %s151_s18  ;;  %p155_p6 = scmp.lt.u32.totalorder %s151_s18, %s206_s2 }
  0xe4   :  { %p157_p7 = pnand %p155_p6, %p152_p5 }
  0xe6   :  { %160 = shalt.err (!%p157_p7)
}
  0xe7   :  { %s166_s23 = smov 128   ;;  %s167_s24 = smov 8  }
  0xe8   :  { %111 = dma.vmem_to_hbm [thread:$0]  %s106_s16, 256, %s206_s2, [#allocation4], %s166_s23, %s166_s23, %s167_s24  }
  0xe9   :  { %161 = dma.done.wait [#allocation4], 256  }
  0xea   :  { %162 = vsyncadd [#allocation4], 4294967040 }
  0xeb   :  { %115 = vsyncpa [#allocation4], 1 }

// kernel: _lambda_.19
= control target key start
LH: loop header
LB: loop body
LE: loop exit
PB: predicated region body
PF: predicated region fallthrough
CT: control target
= control target key end

     0   :  { %vm25_vm0 = vcmask 261120   ;;  %v359_v0 = vmov 0.0   ;;  %vm360_vm1 = vmmov 0   ;;  %vm204_vm2 = vcmask 523264   ;;  %s436_s1 = inlined_call_operand.vmem [shape: bf16[32,64], index: 1, kind: input, shape index: {}]   ;;  %s437_s0 = inlined_call_operand.vmem [shape: bf16[16,32], index: 0, kind: input, shape index: {}]   ;;  %s438_s2 = inlined_call_operand.vmem [shape: bf16[32,64], index: 2, kind: input, shape index: {}]   ;;  %s439_s3 = inlined_call_operand.vmem [shape: bf16[64,32], index: 3, kind: input, shape index: {}]   ;;  %s440_s4 = inlined_call_operand.vmem [shape: bf16[16,32], index: 4, kind: input, shape index: {}]   ;;  %s441_s5 = inlined_call_operand.vmem [shape: bf16[16,32], index: 5, kind: output, shape index: {}]  }
   0x1   :  { %312 = vmatprep.subr.bf16.mxu1 %v359_v0  ;;  %v342_v1 = vld [vmem:[%s436_s1] sm:$0xff]   ;;  %316 = vmatprep.mubr.msk.bf16.mxu1 %vm360_vm1, %v359_v0  ;;  %26 = vst.msk [vmem:[#allocation2] sm:$0xff] %vm25_vm0, %v359_v0  ;;  %27 = vst.msk [vmem:[#allocation2 + $0x8] sm:$0xff] %vm25_vm0, %v359_v0  ;;  %v343_v2 = vld [vmem:[%s436_s1 + $0x8] sm:$0xff]   ;;  %vm272_vm3 = vcmask 257024  }
   0x2   :  { %328 = vmatprep.subr.bf16.mxu0 %v359_v0  ;;  %336 = vmatprep.mubr.msk.bf16.mxu0 %vm360_vm1, %v359_v0  ;;  %v344_v3 = vld [vmem:[%s437_s0] sm:$0xff]   ;;  %v346_v5 = vld [vmem:[%s438_s2 + $0x8] sm:$0xff]   ;;  %v349_v8 = vld [vmem:[%s439_s3 + $0x10] sm:$0xff]  }
   0x3   :  { %313 = vmatpush3.bf16.msra.mxu1 %v342_v1  ;;  %v345_v4 = vld [vmem:[%s438_s2] sm:$0xff]   ;;  %v348_v7 = vld [vmem:[%s439_s3 + $0x8] sm:$0xff]   ;;  %v350_v9 = vld [vmem:[%s439_s3 + $0x18] sm:$0xff]  }
   0x4   :  { %314 = vmatprep.subr.bf16.mxu1 %v359_v0  ;;  %v347_v6 = vld [vmem:[%s439_s3] sm:$0xff]  }
   0x5   :  { %329 = vmatpush3.bf16.msra.mxu0 %v347_v6  ;;  %v298_v39 = vld [vmem:[%s440_s4] sm:$0xff]  }
   0x6   :  { %330 = vmatprep.subr.bf16.mxu0 %v359_v0  ;;  %v299_v40 = vunpack.c.l.bf16 %v298_v39  ;;  %v300_v41 = vunpack.c.h.bf16 %v298_v39 }
   0x7   :  { %315 = vmatpush3.bf16.msra.mxu1 %v343_v2 }
   0x8   :  { %320 = vmatprep.subr.bf16.mxu1 %v359_v0  ;;  %v169_v31 = vld [vmem:[#allocation2] sm:$0xff]  ;;  %v170_v33 = vld [vmem:[#allocation2 + $0x8] sm:$0xff] }
   0x9   :  { %331 = vmatpush3.bf16.msra.mxu0 %v348_v7 }
   0xa   :  { %317 = vmatmul.mubr.msk.bf16.vlgmr.msra.gmra.mrb[0].mxu1 %vm25_vm0, %v344_v3  ;;  %332 = vmatprep.subr.bf16.mxu0 %v359_v0 }
   0xb   :  { %321 = vmatpush3.bf16.msra.mxu1 %v345_v4  ;;  %324 = vmatprep.mubr.msk.bf16.mxu1 %vm360_vm1, %v359_v0 }
   0xc   :  { %322 = vmatprep.subr.bf16.mxu1 %v359_v0 }
   0xd   :  { %333 = vmatpush3.bf16.msra.mxu0 %v349_v8 }
   0xe   :  { %334 = vmatprep.subr.bf16.mxu0 %v359_v0 }
   0xf   :  { %323 = vmatpush3.bf16.msra.mxu1 %v346_v5 }
  0x11   :  { %335 = vmatpush3.bf16.msra.mxu0 %v350_v9 }
  0x12   :  { %325 = vmatmul.mubr.msk.bf16.vlgmr.msra.gmra.mrb[4].mxu1 %vm25_vm0, %v344_v3 }
  0xdd   :  { %v89_v10 = vpop.f32.mrb[0].mxu1 }
  0xde   :  { %v286_v11 = vmul.f32 -1.442695, %v89_v10  ;;  %v318_v12 = vpop.f32.mrb[1].mxu1 }
  0xdf   :  { %v92_v13 = vpop.f32.mrb[2].mxu1 }
  0xe0   :  { %351 = vpow2.f32 %v286_v11  ;;  %v287_v14 = vmul.f32 -1.442695, %v92_v13  ;;  %v319_v15 = vpop.f32.mrb[3].mxu1 }
  0xe2   :  { %353 = vpow2.f32 %v287_v14 }
  0xe5   :  { %v146_v16 = vpop.f32.mrb[4].mxu1 }
  0xe6   :  { %v326_v17 = vpop.f32.mrb[5].mxu1 }
  0xe7   :  { %v149_v18 = vpop.f32.mrb[6].mxu1 }
  0xe8   :  { %v327_v19 = vpop.f32.mrb[7].mxu1 }
  0xea   :  { %v352_v20 = vpop.eup %351 }
  0xeb   :  { %v159_v21 = vadd.f32 1.0, %v352_v20 }
  0xec   :  { %v354_v22 = vpop.eup %353 }
  0xed   :  { %355 = vrcp.f32 %v159_v21  ;;  %v160_v23 = vadd.f32 1.0, %v354_v22 }
  0xef   :  { %357 = vrcp.f32 %v160_v23 }
  0xf7   :  { %v356_v24 = vpop.eup %355 }
  0xf8   :  { %v165_v25 = vmul.f32 %v356_v24, %v89_v10 }
  0xf9   :  { %v358_v26 = vpop.eup %357 }
  0xfa   :  { %v166_v27 = vmul.f32 %v358_v26, %v92_v13  ;;  %v167_v28 = vmul.f32 %v165_v25, %v146_v16 }
  0xfc   :  { %v168_v29 = vmul.f32 %v166_v27, %v149_v18 }
  0xfe   :  { %v171_v30 = vpack.c.bf16 %v168_v29, %v167_v28 }
 0x100   :  { %337 = vmatmul.mubr.msk.bf16.vlgmr.msra.gmra.mrb[0].mxu0 %vm204_vm2, %v171_v30 }
 0x1d3   :  { %v242_v32 = vpop.f32.mrb[0].mxu0 }
 0x1d4   :  { %v249_v34 = vadd.f32 %v242_v32, %v169_v31  ;;  %v338_v35 = vpop.f32.mrb[1].mxu0 }
 0x1d5   :  { %v245_v36 = vpop.f32.mrb[2].mxu0 }
 0x1d6   :  { %251 = vst.msk [vmem:[#allocation2] sm:$0xff] %vm25_vm0, %v249_v34  ;;  %v250_v37 = vadd.f32 %v245_v36, %v170_v33  ;;  %v339_v38 = vpop.f32.mrb[3].mxu0 }
 0x1d8   :  { %252 = vst.msk [vmem:[#allocation2 + $0x8] sm:$0xff] %vm25_vm0, %v250_v37 }
 0x1dd   :  { %v260_v42 = vld [vmem:[#allocation2] sm:$0xff] }
 0x1de   :  { %v262_v43 = vadd.f32 %v299_v40, %v260_v42 }
 0x1df   :  { %v261_v44 = vld [vmem:[#allocation2 + $0x8] sm:$0xff] }
 0x1e0   :  { %v295_v45 = vpack.c.bf16 %v262_v43, %v262_v43  ;;  %v263_v46 = vadd.f32 %v300_v41, %v261_v44 }
 0x1e2   :  { %273 = vst.msk [vmem:[%s441_s5] sm:$0xf] %vm272_vm3, %v295_v45  ;;  %v296_v47 = vpack.c.bf16 %v263_v46, %v263_v46 }
 0x1e4   :  { %274 = vst.msk [vmem:[%s441_s5 + $0x4] sm:$0xf] %vm272_vm3, %v296_v47 }

</bundles_post_ra>
